<compile_context>
chip_gen: v6e
topology: v6e:2x2x1
jax: 0.10.0
libtpu: 0.0.40
codegen_flags: <defaults>
</compile_context>

<pallas_src>
import functools

import jax
import jax.numpy as jnp
import numpy as np
from jax import lax
from jax.experimental import pallas as pl
from jax.experimental.pallas import tpu as pltpu

INPUT_SIZE = 768
HIDDEN_SIZE = 32
FC_SIZE = 16
NUM_LAYERS = 1          # single-layer GRU (num_layers=1 in the reference module)

GATE_PAD = 128          # 3*HIDDEN_SIZE = 96 padded to a full 128-lane vreg
TIME_TILE = 8           # timesteps per grid step in the recurrence kernel
PROJ_TM = 256           # row tile of the bulk input-projection matmul


def _round_up(x, m):
    return (x + m - 1) // m * m


# ---------------------------------------------------------------------------
# Kernel 1: bulk input projection  gi = X @ W_ih^T + b_ih  (all timesteps)
# ---------------------------------------------------------------------------
def _input_proj_kernel(x_ref, w_ref, b_ref, o_ref):
    o_ref[...] = (jnp.dot(x_ref[...], w_ref[...],
                          preferred_element_type=jnp.float32) + b_ref[...])


def _input_projection(x_flat_bf16, w_bf16, bias_f32):
    m = x_flat_bf16.shape[0]
    return pl.pallas_call(
        _input_proj_kernel,
        out_shape=jax.ShapeDtypeStruct((m, GATE_PAD), jnp.float32),
        grid=(m // PROJ_TM,),
        in_specs=[
            pl.BlockSpec((PROJ_TM, INPUT_SIZE), lambda i: (i, 0)),
            pl.BlockSpec((INPUT_SIZE, GATE_PAD), lambda i: (0, 0)),
            pl.BlockSpec((1, GATE_PAD), lambda i: (0, 0)),
        ],
        out_specs=pl.BlockSpec((PROJ_TM, GATE_PAD), lambda i: (i, 0)),
        compiler_params=pltpu.CompilerParams(
            dimension_semantics=("parallel",),
            vmem_limit_bytes=32 * 1024 * 1024),
    )(x_flat_bf16, w_bf16, bias_f32)


# ---------------------------------------------------------------------------
# Kernel 2: masked GRU recurrence over time-blocked gi + fused final Linear
# ---------------------------------------------------------------------------
def _gru_recurrence_kernel(gi_ref, len_ref, whh_ref, bhh_ref, wfc_ref, bfc_ref,
                           out_ref, h_scr, *, hidden_size, time_tile):
    H = hidden_size
    t_blk = pl.program_id(1)

    @pl.when(t_blk == 0)
    def _():
        h_scr[...] = jnp.zeros_like(h_scr)

    lengths = len_ref[...]                       # (Bs, 1) int32
    t0 = t_blk * time_tile

    def step(i, h):
        gi = gi_ref[i]                           # (Bs, GATE_PAD) f32
        gh = (jnp.dot(h, whh_ref[...], preferred_element_type=jnp.float32)
              + bhh_ref[...])
        r = jax.nn.sigmoid(gi[:, 0:H] + gh[:, 0:H])
        z = jax.nn.sigmoid(gi[:, H:2 * H] + gh[:, H:2 * H])
        n = jnp.tanh(gi[:, 2 * H:3 * H] + r * gh[:, 2 * H:3 * H])
        h_new = (1.0 - z) * n + z * h
        valid = (t0 + i) < lengths               # sequences still running
        return jnp.where(valid, h_new, h)

    h_scr[...] = lax.fori_loop(0, time_tile, step, h_scr[...], unroll=True)

    @pl.when(t_blk == pl.num_programs(1) - 1)
    def _():
        out_ref[...] = (jnp.dot(h_scr[...], wfc_ref[...],
                                preferred_element_type=jnp.float32)
                        + bfc_ref[...])


def _gru_fc(gi, lengths, whh_pad, bhh_pad, wfc_t, bfc):
    t_pad, b_pad, _ = gi.shape
    nt = t_pad // TIME_TILE
    nb = 2 if (b_pad % 16 == 0) else 1           # batch sharding -> 2 TCs on v7x
    bs = b_pad // nb

    kernel = functools.partial(_gru_recurrence_kernel,
                               hidden_size=HIDDEN_SIZE, time_tile=TIME_TILE)
    return pl.pallas_call(
        kernel,
        out_shape=jax.ShapeDtypeStruct((b_pad, FC_SIZE), jnp.float32),
        grid=(nb, nt),
        in_specs=[
            pl.BlockSpec((TIME_TILE, bs, GATE_PAD), lambda b, t: (t, b, 0)),
            pl.BlockSpec((bs, 1), lambda b, t: (b, 0)),
            pl.BlockSpec((HIDDEN_SIZE, GATE_PAD), lambda b, t: (0, 0)),
            pl.BlockSpec((1, GATE_PAD), lambda b, t: (0, 0)),
            pl.BlockSpec((HIDDEN_SIZE, FC_SIZE), lambda b, t: (0, 0)),
            pl.BlockSpec((1, FC_SIZE), lambda b, t: (0, 0)),
        ],
        out_specs=pl.BlockSpec((bs, FC_SIZE), lambda b, t: (b, 0)),
        scratch_shapes=[pltpu.VMEM((bs, HIDDEN_SIZE), jnp.float32)],
        compiler_params=pltpu.CompilerParams(
            dimension_semantics=("parallel", "arbitrary"),
            vmem_limit_bytes=32 * 1024 * 1024),
    )(gi, lengths, whh_pad, bhh_pad, wfc_t, bfc)


# ---------------------------------------------------------------------------
# Parameters & forward wrapper
# ---------------------------------------------------------------------------
def init_params(key):
    """PyTorch-shaped init (uniform +-1/sqrt(H)); weights pre-transposed and
    gate dimension zero-padded 3H=96 -> 128 lanes."""
    k = 1.0 / np.sqrt(HIDDEN_SIZE)
    ks = jax.random.split(key, 6)
    w_ih = jax.random.uniform(ks[0], (3 * HIDDEN_SIZE, INPUT_SIZE), jnp.float32, -k, k)
    w_hh = jax.random.uniform(ks[1], (3 * HIDDEN_SIZE, HIDDEN_SIZE), jnp.float32, -k, k)
    b_ih = jax.random.uniform(ks[2], (3 * HIDDEN_SIZE,), jnp.float32, -k, k)
    b_hh = jax.random.uniform(ks[3], (3 * HIDDEN_SIZE,), jnp.float32, -k, k)
    w_fc = jax.random.uniform(ks[4], (FC_SIZE, HIDDEN_SIZE), jnp.float32, -k, k)
    b_fc = jax.random.uniform(ks[5], (FC_SIZE,), jnp.float32, -k, k)

    pad = GATE_PAD - 3 * HIDDEN_SIZE
    return {
        "wih_t_pad": jnp.pad(w_ih.T, ((0, 0), (0, pad))),            # (D, 128)
        "whh_t_pad": jnp.pad(w_hh.T, ((0, 0), (0, pad))),            # (H, 128)
        "bih_pad": jnp.pad(b_ih, (0, pad)).reshape(1, GATE_PAD),
        "bhh_pad": jnp.pad(b_hh, (0, pad)).reshape(1, GATE_PAD),
        "wfc_t": w_fc.T,                                             # (H, FC)
        "bfc": b_fc.reshape(1, FC_SIZE),
    }


def triplet_gru_forward(anchor_batch, positive_batch, negative_batch, params):
    """Pallas implementation of TripletGRUNetwork.forward.

    Each *_batch is a list of (L_i, INPUT_SIZE) arrays (variable L_i).
    Returns three arrays of shape (NUM_LAYERS, B, FC_SIZE), like PyTorch.
    """
    all_batches = [anchor_batch, positive_batch, negative_batch]
    b_each = len(anchor_batch)
    b_total = 3 * b_each
    max_len = max(seq.shape[0] for batch in all_batches for seq in batch)
    t_pad = _round_up(max_len, TIME_TILE)
    b_pad = _round_up(b_total, 8)

    def pad_seq(seq):
        return jnp.concatenate(
            [seq.astype(jnp.float32),
             jnp.zeros((max_len - seq.shape[0], INPUT_SIZE), jnp.float32)], axis=0)

    x = jnp.stack([pad_seq(s) for batch in all_batches for s in batch], axis=0)
    x = jnp.pad(x, ((0, b_pad - b_total), (0, t_pad - max_len), (0, 0)))
    x_tm = jnp.transpose(x, (1, 0, 2))                         # (T_pad, B_pad, D)

    lens = [s.shape[0] for batch in all_batches for s in batch]
    lengths = jnp.array(lens + [0] * (b_pad - b_total), jnp.int32).reshape(b_pad, 1)

    # 1) bulk input projection on the MXU (bf16 inputs, f32 accumulate)
    m = t_pad * b_pad
    m_pad = _round_up(m, PROJ_TM)
    x_flat = jnp.pad(x_tm.reshape(m, INPUT_SIZE),
                     ((0, m_pad - m), (0, 0))).astype(jnp.bfloat16)
    gi_flat = _input_projection(x_flat,
                                params["wih_t_pad"].astype(jnp.bfloat16),
                                params["bih_pad"])
    gi = gi_flat[:m].reshape(t_pad, b_pad, GATE_PAD)

    # 2) serial masked recurrence + fused final Linear
    out = _gru_fc(gi, lengths, params["whh_t_pad"], params["bhh_pad"],
                  params["wfc_t"], params["bfc"])

    out = out[:b_total]
    a, p, n = out[:b_each], out[b_each:2 * b_each], out[2 * b_each:]
    # PyTorch returns fc(hidden) with hidden of shape (num_layers, B, H).
    return a[None], p[None], n[None]


def _ref_forward(x_tm, lengths, params):
    """Pure-JAX reference of the same math (bf16 input projection, f32 rest)."""
    T, B, _ = x_tm.shape
    H = HIDDEN_SIZE
    gi_all = (jnp.dot(x_tm.astype(jnp.bfloat16).reshape(T * B, INPUT_SIZE),
                      params["wih_t_pad"].astype(jnp.bfloat16),
                      preferred_element_type=jnp.float32).reshape(T, B, GATE_PAD)
              + params["bih_pad"])
    h = jnp.zeros((B, H), jnp.float32)
    for t in range(T):
        gi = gi_all[t]
        gh = h @ params["whh_t_pad"] + params["bhh_pad"]
        r = jax.nn.sigmoid(gi[:, :H] + gh[:, :H])
        z = jax.nn.sigmoid(gi[:, H:2 * H] + gh[:, H:2 * H])
        n = jnp.tanh(gi[:, 2 * H:3 * H] + r * gh[:, 2 * H:3 * H])
        h_new = (1.0 - z) * n + z * h
        h = jnp.where((t < lengths.reshape(-1))[:, None], h_new, h)
    return h @ params["wfc_t"] + params["bfc"]


if __name__ == "__main__":
    key = jax.random.PRNGKey(0)
    pkey, dkey = jax.random.split(key)
    params = init_params(pkey)

    # Small, deterministic variable-length triplet batch (B=2, max seq len 8).
    seq_lens = {"anchor": [8, 5], "positive": [6, 7], "negative": [4, 8]}
    dkeys = jax.random.split(dkey, 6)
    batches = {}
    i = 0
    for name, lens in seq_lens.items():
        seqs = []
        for L in lens:
            seqs.append(jax.random.normal(dkeys[i], (L, INPUT_SIZE), jnp.float32))
            i += 1
        batches[name] = seqs

    a_out, p_out, n_out = triplet_gru_forward(
        batches["anchor"], batches["positive"], batches["negative"], params)
    jax.block_until_ready((a_out, p_out, n_out))

    assert a_out.shape == (NUM_LAYERS, 2, FC_SIZE)
    assert p_out.shape == (NUM_LAYERS, 2, FC_SIZE)
    assert n_out.shape == (NUM_LAYERS, 2, FC_SIZE)

    # Validate against a pure-JAX reference of the same math.
    max_len = max(l for ls in seq_lens.values() for l in ls)
    def pad(seq):
        return jnp.concatenate(
            [seq, jnp.zeros((max_len - seq.shape[0], INPUT_SIZE), seq.dtype)], axis=0)
    x_all = jnp.stack(
        [pad(s) for s in batches["anchor"] + batches["positive"] + batches["negative"]],
        axis=0)
    x_tm_ref = jnp.transpose(x_all, (1, 0, 2))
    lens_all = jnp.array(
        seq_lens["anchor"] + seq_lens["positive"] + seq_lens["negative"], jnp.int32)
    ref = _ref_forward(x_tm_ref, lens_all, params)
    got = jnp.concatenate([a_out[0], p_out[0], n_out[0]], axis=0)
    np.testing.assert_allclose(np.asarray(got), np.asarray(ref), rtol=1e-3, atol=1e-3)

    print("KERNEL_OK")
</pallas_src>

<mosaic_0001>
module attributes {stable_mosaic.version = 11 : i64} {
  func.func @_input_proj_kernel(%arg0: i32, %arg1: memref<256x768xbf16, #tpu.memory_space<vmem>>, %arg2: memref<768x128xbf16, #tpu.memory_space<vmem>>, %arg3: memref<1x128xf32, #tpu.memory_space<vmem>>, %arg4: memref<256x128xf32, #tpu.memory_space<vmem>>) attributes {dimension_semantics = [#tpu.dimension_semantics<parallel>], iteration_bounds = array<i64: 1>, scalar_prefetch = 0 : i64, scratch_operands = 0 : i64, tpu.core_type = #tpu.core_type<tc>, window_params = [{transform_indices = @transform_0, window_bounds = array<i64: 256, 768>}, {pipeline_mode = #tpu.pipeline_mode<synchronous>, transform_indices = @transform_1, window_bounds = array<i64: 768, 128>}, {pipeline_mode = #tpu.pipeline_mode<synchronous>, transform_indices = @transform_2, window_bounds = array<i64: 1, 128>}, {transform_indices = @transform_3, window_bounds = array<i64: 256, 128>}]} {
    %c0 = arith.constant 0 : index
    %c0_0 = arith.constant 0 : index
    %0 = vector.load %arg1[%c0, %c0_0] : memref<256x768xbf16, #tpu.memory_space<vmem>>, vector<256x768xbf16>
    %c0_1 = arith.constant 0 : index
    %c0_2 = arith.constant 0 : index
    %1 = vector.load %arg2[%c0_1, %c0_2] : memref<768x128xbf16, #tpu.memory_space<vmem>>, vector<768x128xbf16>
    %cst = arith.constant dense<0.000000e+00> : vector<256x128xf32>
    %2 = tpu.matmul %0, %1, %cst {dimension_numbers = #tpu.dot_dimension_numbers<[1], [0], [0], [1], [0, 0, 1, 1], [], []>} : vector<256x768xbf16>, vector<768x128xbf16>, vector<256x128xf32> -> vector<256x128xf32>
    %c0_3 = arith.constant 0 : index
    %c0_4 = arith.constant 0 : index
    %3 = vector.load %arg3[%c0_3, %c0_4] : memref<1x128xf32, #tpu.memory_space<vmem>>, vector<1x128xf32>
    %4 = vector.broadcast %3 : vector<1x128xf32> to vector<256x128xf32>
    %5 = arith.addf %2, %4 : vector<256x128xf32>
    %c0_5 = arith.constant 0 : index
    %c0_6 = arith.constant 0 : index
    %6 = vector.load %arg4[%c0_5, %c0_6] : memref<256x128xf32, #tpu.memory_space<vmem>>, vector<256x128xf32>
    tpu.vector_store %arg4[%c0_5, %c0_6], %5 {strides = array<i32>} : memref<256x128xf32, #tpu.memory_space<vmem>>, vector<256x128xf32>,
    return
  }
  func.func @transform_0(%arg0: i32) -> (i32, i32) {
    %c0_i32 = arith.constant 0 : i32
    %c0_i32_0 = arith.constant 0 : i32
    return %arg0, %c0_i32 : i32, i32
  }
  func.func @transform_1(%arg0: i32) -> (i32, i32) {
    %c0_i32 = arith.constant 0 : i32
    %c0_i32_0 = arith.constant 0 : i32
    %c0_i32_1 = arith.constant 0 : i32
    return %c0_i32, %c0_i32_0 : i32, i32
  }
  func.func @transform_2(%arg0: i32) -> (i32, i32) {
    %c0_i32 = arith.constant 0 : i32
    %c0_i32_0 = arith.constant 0 : i32
    %c0_i32_1 = arith.constant 0 : i32
    return %c0_i32, %c0_i32_0 : i32, i32
  }
  func.func @transform_3(%arg0: i32) -> (i32, i32) {
    %c0_i32 = arith.constant 0 : i32
    %c0_i32_0 = arith.constant 0 : i32
    return %arg0, %c0_i32 : i32, i32
  }
}

</mosaic_0001>

<bundles_post_ra>
// kernel: tpu_custom_call.1
= control target key start
LH: loop header
LB: loop body
LE: loop exit
PB: predicated region body
PF: predicated region fallthrough
CT: control target
= control target key end

     0   :  { %8 = vsyncpa [#allocation3], 0  ;;  %s2527_s0 = inlined_call_operand.hbm [shape: bf16[256,768], index: 0, kind: input, shape index: {}]   ;;  %s2528_s1 = inlined_call_operand.hbm [shape: bf16[768,128], index: 1, kind: input, shape index: {}]   ;;  %s2529_s2 = inlined_call_operand.vmem [shape: f32[1,128], index: 2, kind: input, shape index: {}]   ;;  %s2530_s3 = inlined_call_operand.hbm [shape: f32[256,128], index: 3, kind: output, shape index: {}]  }
   0x1   :  { %9 = vsyncpa [#allocation6], 0 }
   0x2   :  { %10 = vsyncpa [#allocation4], 0  ;;  %s2308_s12 = smov [#allocation2]  }
   0x3   :  { %s16_s13 = sshll.u32 %s2308_s12, 4  ;;  %s17_s13 = int_to_ptr.vmem [resolvable:$true] %s16_s13 }
   0x4   :  { %s2250_s14 = scalar_lea.vmem %s17_s13, 12288  ;;  %p2255_p1 = scmp.lt.s32.totalorder %s17_s13, %s17_s13 }
   0x5   :  { %p2251_p0 = scmp.ne.s32.totalorder %s17_s13, %s2250_s14  ;;  %p2256_p2 = scmp.lt.s32.totalorder %s2250_s14, %s2250_s14 }
   0x7   :  { %p2257_p3 = por %p2256_p2, %p2255_p1 }
   0x9   :  { %p2258_p4 = pnand %p2257_p3, %p2251_p0 }
   0xb   :  { %2261 = shalt.err (!%p2258_p4)
}
   0xc   :  { %s2309_s15 = smov 384   ;;  %s2310_s16 = smov 24  }
   0xd   :  { %22 = dma.hbm_to_vmem [thread:$0]  %s2527_s0, 12288, %s17_s13, [#allocation3], %s2309_s15, %s2309_s15, %s2310_s16  }
   0xe   :  { %s2311_s19 = smov [#allocation5]  }
   0xf   :  { %s28_s20 = sshll.u32 %s2311_s19, 4  ;;  %s29_s20 = int_to_ptr.vmem [resolvable:$true] %s28_s20 }
  0x10   :  { %s2270_s21 = scalar_lea.vmem %s29_s20, 6144  ;;  %p2275_p6 = scmp.lt.s32.totalorder %s29_s20, %s29_s20 }
  0x11   :  { %p2271_p5 = scmp.ne.s32.totalorder %s29_s20, %s2270_s21  ;;  %p2276_p7 = scmp.lt.s32.totalorder %s2270_s21, %s2270_s21 }
  0x13   :  { %p2277_p8 = por %p2276_p7, %p2275_p6 }
  0x15   :  { %p2278_p9 = pnand %p2277_p8, %p2271_p5 }
  0x17   :  { %2281 = shalt.err (!%p2278_p9)
}
  0x18   :  { %s2312_s22 = smov 64   ;;  %s2313_s23 = smov 4  }
  0x19   :  { %34 = dma.hbm_to_vmem [thread:$0]  %s2528_s1, 6144, %s29_s20, [#allocation6], %s2312_s22, %s2312_s22, %s2313_s23  }
  0x1a   :  { %2302 = dma.done.wait [#allocation3], 12288  }
  0x1b   :  { %2303 = vsyncadd [#allocation3], 4294955008 }
  0x1c   :  { %2304 = dma.done.wait [#allocation6], 6144  }
  0x1d   :  { %2305 = vsyncadd [#allocation6], 4294961152  ;;  %v2050_v0 = vld [vmem:[#allocation5 + $0x78] sm:$0xff]   ;;  %v2052_v2 = vld [vmem:[#allocation5 + $0x70] sm:$0xff]  }
  0x1e   :  { %v2051_v1 = vld [vmem:[#allocation5 + $0x38] sm:$0xff]   ;;  %1689 = vmatprep.subr.bf16.mxu0 %v2050_v0  ;;  %2025 = vmatprep.subr.bf16.mxu1 %v2050_v0  ;;  %v2053_v3 = vld [vmem:[#allocation5 + $0x30] sm:$0xff]   ;;  %v2054_v4 = vld [vmem:[#allocation5 + $0x68] sm:$0xff]  }
  0x1f   :  { %1690 = vmatpush3.bf16.msra.mxu0 %v2051_v1  ;;  %2033 = vmatpush3.bf16.msra.mxu1 %v2051_v1  ;;  %v2055_v5 = vld [vmem:[#allocation5 + $0x28] sm:$0xff]   ;;  %v2056_v6 = vld [vmem:[#allocation5 + $0x60] sm:$0xff]   ;;  %v2058_v8 = vld [vmem:[#allocation5 + $0x58] sm:$0xff]  }
  0x20   :  { %1691 = vmatprep.subr.bf16.mxu0 %v2052_v2  ;;  %2026 = vmatprep.subr.bf16.mxu1 %v2052_v2  ;;  %v2057_v7 = vld [vmem:[#allocation5 + $0x20] sm:$0xff]   ;;  %v2059_v9 = vld [vmem:[#allocation5 + $0x18] sm:$0xff]   ;;  %v2060_v10 = vld [vmem:[#allocation5 + $0x50] sm:$0xff]  }
  0x21   :  { %v2068_v11 = vld [vmem:[#allocation2 + $0x4] ss:$24 sps:$4 sm:$0xff]   ;;  %v2061_v13 = vld [vmem:[#allocation5 + $0x10] sm:$0xff]   ;;  %v2062_v14 = vld [vmem:[#allocation5 + $0x48] sm:$0xff]  }
  0x22   :  { %v2071_v12 = vld [vmem:[#allocation2 + $0x184] ss:$24 sps:$4 sm:$0xff]   ;;  %1043 = vmatprep.mubr.bf16.mxu0 %v2068_v11  ;;  %v2063_v15 = vld [vmem:[#allocation5 + $0x8] sm:$0xff]   ;;  %v2066_v19 = vld [vmem:[#allocation2] ss:$24 sps:$4 sm:$0xff]  }
  0x23   :  { %1692 = vmatpush3.bf16.msra.mxu0 %v2053_v3  ;;  %2034 = vmatpush3.bf16.msra.mxu1 %v2053_v3  ;;  %v2064_v16 = vld [vmem:[#allocation5 + $0x40] sm:$0xff]   ;;  %v2072_v18 = vld [vmem:[#allocation5 + $0xf8] sm:$0xff]   ;;  %v2076_v24 = vld [vmem:[#allocation2 + $0x34] ss:$24 sps:$4 sm:$0xff]  }
  0x24   :  { %1693 = vmatprep.subr.bf16.mxu0 %v2054_v4  ;;  %2027 = vmatprep.subr.bf16.mxu1 %v2054_v4  ;;  %v2065_v17 = vld [vmem:[#allocation5] sm:$0xff]   ;;  %v2074_v20 = vld [vmem:[#allocation5 + $0x178] sm:$0xff]   ;;  %v2078_v25 = vld [vmem:[#allocation2 + $0x1b4] ss:$24 sps:$4 sm:$0xff]  }
  0x25   :  { %1107 = vmatprep.mubr.bf16.mxu1 %v2071_v12  ;;  %v2069_v21 = vld [vmem:[#allocation2 + $0x180] ss:$24 sps:$4 sm:$0xff]   ;;  %v2082_v26 = vld [vmem:[#allocation5 + $0xf0] sm:$0xff]   ;;  %v2092_v30 = vld [vmem:[#allocation5 + $0xe8] sm:$0xff]  }
  0x26   :  { %v2073_v22 = vld [vmem:[#allocation5 + $0xb8] sm:$0xff]   ;;  %v2083_v27 = vld [vmem:[#allocation5 + $0xb0] sm:$0xff]   ;;  %v2094_v33 = vld [vmem:[#allocation5 + $0x168] sm:$0xff]  }
  0x27   :  { %1694 = vmatpush3.bf16.msra.mxu0 %v2055_v5  ;;  %2035 = vmatpush3.bf16.msra.mxu1 %v2055_v5  ;;  %v2075_v23 = vld [vmem:[#allocation5 + $0x138] sm:$0xff]   ;;  %v2084_v28 = vld [vmem:[#allocation5 + $0x170] sm:$0xff]   ;;  %v2093_v36 = vld [vmem:[#allocation5 + $0xa8] sm:$0xff]  }
  0x28   :  { %1695 = vmatprep.subr.bf16.mxu0 %v2056_v6  ;;  %2028 = vmatprep.subr.bf16.mxu1 %v2056_v6  ;;  %v2085_v29 = vld [vmem:[#allocation5 + $0x130] sm:$0xff]   ;;  %v2086_v34 = vld [vmem:[#allocation2 + $0x64] ss:$24 sps:$4 sm:$0xff]   ;;  %v2095_v37 = vld [vmem:[#allocation5 + $0x128] sm:$0xff]  }
  0x29   :  { %v2080_v31 = vld [vmem:[#allocation2 + $0x30] ss:$24 sps:$4 sm:$0xff]   ;;  %v2088_v35 = vld [vmem:[#allocation2 + $0x1e4] ss:$24 sps:$4 sm:$0xff]   ;;  %v2090_v40 = vld [vmem:[#allocation2 + $0x60] ss:$24 sps:$4 sm:$0xff]  }
  0x2a   :  { %v2081_v32 = vld [vmem:[#allocation2 + $0x1b0] ss:$24 sps:$4 sm:$0xff]   ;;  %v2102_v38 = vld [vmem:[#allocation5 + $0xe0] sm:$0xff]   ;;  %v2096_v44 = vld [vmem:[#allocation2 + $0x94] ss:$24 sps:$4 sm:$0xff]  }
  0x2b   :  { %1696 = vmatpush3.bf16.msra.mxu0 %v2057_v7  ;;  %2036 = vmatpush3.bf16.msra.mxu1 %v2057_v7  ;;  %v2104_v39 = vld [vmem:[#allocation5 + $0x160] sm:$0xff]   ;;  %v2098_v45 = vld [vmem:[#allocation2 + $0x214] ss:$24 sps:$4 sm:$0xff]   ;;  %v2112_v46 = vld [vmem:[#allocation5 + $0xd8] sm:$0xff]  }
  0x2c   :  { %1697 = vmatprep.subr.bf16.mxu0 %v2058_v8  ;;  %2029 = vmatprep.subr.bf16.mxu1 %v2058_v8  ;;  %v2091_v41 = vld [vmem:[#allocation2 + $0x1e0] ss:$24 sps:$4 sm:$0xff]   ;;  %v2100_v50 = vld [vmem:[#allocation2 + $0x90] ss:$24 sps:$4 sm:$0xff]   ;;  %v2106_v53 = vld [vmem:[#allocation2 + $0xc4] ss:$24 sps:$4 sm:$0xff]  }
  0x2d   :  { %v2103_v42 = vld [vmem:[#allocation5 + $0xa0] sm:$0xff]   ;;  %v2113_v47 = vld [vmem:[#allocation5 + $0x98] sm:$0xff]   ;;  %v2101_v51 = vld [vmem:[#allocation2 + $0x210] ss:$24 sps:$4 sm:$0xff]  }
  0x2e   :  { %v2105_v43 = vld [vmem:[#allocation5 + $0x120] sm:$0xff]   ;;  %v2114_v48 = vld [vmem:[#allocation5 + $0x158] sm:$0xff]   ;;  %v2122_v52 = vld [vmem:[#allocation5 + $0xd0] sm:$0xff]  }
  0x2f   :  { %1698 = vmatpush3.bf16.msra.mxu0 %v2059_v9  ;;  %2037 = vmatpush3.bf16.msra.mxu1 %v2059_v9  ;;  %v2115_v49 = vld [vmem:[#allocation5 + $0x118] sm:$0xff]   ;;  %v2123_v55 = vld [vmem:[#allocation5 + $0x90] sm:$0xff]   ;;  %v2132_v58 = vld [vmem:[#allocation5 + $0xc8] sm:$0xff]  }
  0x30   :  { %1699 = vmatprep.subr.bf16.mxu0 %v2060_v10  ;;  %2030 = vmatprep.subr.bf16.mxu1 %v2060_v10  ;;  %v2108_v54 = vld [vmem:[#allocation2 + $0x244] ss:$24 sps:$4 sm:$0xff]   ;;  %v2124_v56 = vld [vmem:[#allocation5 + $0x150] sm:$0xff]   ;;  %v2110_v59 = vld [vmem:[#allocation2 + $0xc0] ss:$24 sps:$4 sm:$0xff]  }
  0x31   :  { %v2125_v57 = vld [vmem:[#allocation5 + $0x110] sm:$0xff]   ;;  %v2111_v60 = vld [vmem:[#allocation2 + $0x240] ss:$24 sps:$4 sm:$0xff]   ;;  %v2133_v61 = vld [vmem:[#allocation5 + $0x88] sm:$0xff]  }
  0x32   :  { %v2116_v62 = vld [vmem:[#allocation2 + $0xf4] ss:$24 sps:$4 sm:$0xff]   ;;  %v2142_v2 = vld [vmem:[#allocation5 + $0xc0] sm:$0xff]   ;;  %v2120_v6 = vld [vmem:[#allocation2 + $0xf0] ss:$24 sps:$4 sm:$0xff]  }
  0x33   :  { %1700 = vmatpush3.bf16.msra.mxu0 %v2061_v13  ;;  %2038 = vmatpush3.bf16.msra.mxu1 %v2061_v13  ;;  %v2134_v63 = vld [vmem:[#allocation5 + $0x148] sm:$0xff]   ;;  %v2143_v3 = vld [vmem:[#allocation5 + $0x80] sm:$0xff]  }
  0x34   :  { %1701 = vmatprep.subr.bf16.mxu0 %v2062_v14  ;;  %2031 = vmatprep.subr.bf16.mxu1 %v2062_v14  ;;  %v2135_v0 = vld [vmem:[#allocation5 + $0x108] sm:$0xff]   ;;  %v2144_v4 = vld [vmem:[#allocation5 + $0x140] sm:$0xff]  }
  0x35   :  { %v2118_v1 = vld [vmem:[#allocation2 + $0x274] ss:$24 sps:$4 sm:$0xff]   ;;  %v2145_v5 = vld [vmem:[#allocation5 + $0x100] sm:$0xff]   ;;  %v2121_v7 = vld [vmem:[#allocation2 + $0x270] ss:$24 sps:$4 sm:$0xff]  }
  0x36   :  { %v2126_v8 = vld [vmem:[#allocation2 + $0x124] ss:$24 sps:$4 sm:$0xff]   ;;  %v2130_v10 = vld [vmem:[#allocation2 + $0x120] ss:$24 sps:$4 sm:$0xff]   ;;  %v2136_v12 = vld [vmem:[#allocation2 + $0x154] ss:$24 sps:$4 sm:$0xff]  }
  0x37   :  { %1702 = vmatpush3.bf16.msra.mxu0 %v2063_v15  ;;  %2039 = vmatpush3.bf16.msra.mxu1 %v2063_v15  ;;  %v2128_v9 = vld [vmem:[#allocation2 + $0x2a4] ss:$24 sps:$4 sm:$0xff]   ;;  %v2131_v11 = vld [vmem:[#allocation2 + $0x2a0] ss:$24 sps:$4 sm:$0xff]   ;;  %v2138_v13 = vld [vmem:[#allocation2 + $0x2d4] ss:$24 sps:$4 sm:$0xff]  }
  0x38   :  { %1703 = vmatprep.subr.bf16.mxu0 %v2064_v16  ;;  %2032 = vmatprep.subr.bf16.mxu1 %v2064_v16  ;;  %v2140_v14 = vld [vmem:[#allocation2 + $0x150] ss:$24 sps:$4 sm:$0xff]   ;;  %v2148_v16 = vld [vmem:[#allocation2 + $0xc] ss:$24 sps:$4 sm:$0xff]  }
  0x39   :  { %v2141_v15 = vld [vmem:[#allocation2 + $0x2d0] ss:$24 sps:$4 sm:$0xff]  }
  0x3b   :  { %1704 = vmatpush3.bf16.msra.mxu0 %v2065_v17  ;;  %2040 = vmatpush3.bf16.msra.mxu1 %v2065_v17  ;;  %v2151_v17 = vld [vmem:[#allocation2 + $0x14] ss:$24 sps:$4 sm:$0xff]  }
  0x3c   :  { %1801 = vmatprep.subr.bf16.mxu1 %v2072_v18  ;;  %1913 = vmatprep.subr.bf16.mxu0 %v2074_v20  ;;  %v2146_v18 = vld [vmem:[#allocation2 + $0x8] ss:$24 sps:$4 sm:$0xff]   ;;  %v2152_v20 = vld [vmem:[#allocation2 + $0x3c] ss:$24 sps:$4 sm:$0xff]  }
  0x3e   :  { %1044 = vmatmul.mubr.bf16.vlgmr.msra.gmra.mxu0 %v2066_v19  ;;  %1108 = vmatmul.mubr.bf16.vlgmr.msra.gmra.mxu1 %v2069_v21  ;;  %v2149_v19 = vld [vmem:[#allocation2 + $0x10] ss:$24 sps:$4 sm:$0xff]   ;;  %v2154_v21 = vld [vmem:[#allocation2 + $0x44] ss:$24 sps:$4 sm:$0xff]  }
  0x3f   :  { %1802 = vmatpush3.bf16.msra.mxu1 %v2073_v22  ;;  %1914 = vmatpush3.bf16.msra.mxu0 %v2075_v23  ;;  %v2156_v22 = vld [vmem:[#allocation2 + $0x38] ss:$24 sps:$4 sm:$0xff]  }
  0x40   :  { %1051 = vmatprep.mubr.bf16.mxu0 %v2076_v24  ;;  %1115 = vmatprep.mubr.bf16.mxu1 %v2078_v25  ;;  %v2157_v23 = vld [vmem:[#allocation2 + $0x40] ss:$24 sps:$4 sm:$0xff]   ;;  %v2158_v24 = vld [vmem:[#allocation2 + $0x6c] ss:$24 sps:$4 sm:$0xff]  }
  0x41   :  { %1803 = vmatprep.subr.bf16.mxu1 %v2082_v26  ;;  %1915 = vmatprep.subr.bf16.mxu0 %v2084_v28  ;;  %v2160_v25 = vld [vmem:[#allocation2 + $0x74] ss:$24 sps:$4 sm:$0xff]   ;;  %v2162_v26 = vld [vmem:[#allocation2 + $0x68] ss:$24 sps:$4 sm:$0xff]  }
  0x42   :  { %v2164_v28 = vld [vmem:[#allocation2 + $0x9c] ss:$24 sps:$4 sm:$0xff]  }
  0x43   :  { %1804 = vmatpush3.bf16.msra.mxu1 %v2083_v27  ;;  %1916 = vmatpush3.bf16.msra.mxu0 %v2085_v29  ;;  %v2163_v27 = vld [vmem:[#allocation2 + $0x70] ss:$24 sps:$4 sm:$0xff]   ;;  %v2166_v29 = vld [vmem:[#allocation2 + $0xa4] ss:$24 sps:$4 sm:$0xff]  }
  0x44   :  { %1805 = vmatprep.subr.bf16.mxu1 %v2092_v30  ;;  %1917 = vmatprep.subr.bf16.mxu0 %v2094_v33  ;;  %v2168_v30 = vld [vmem:[#allocation2 + $0x98] ss:$24 sps:$4 sm:$0xff]   ;;  %v2172_v33 = vld [vmem:[#allocation2 + $0xd4] ss:$24 sps:$4 sm:$0xff]  }
  0x46   :  { %1052 = vmatmul.mubr.bf16.gmra.mxu0 %v2080_v31  ;;  %1116 = vmatmul.mubr.bf16.gmra.mxu1 %v2081_v32  ;;  %v2169_v31 = vld [vmem:[#allocation2 + $0xa0] ss:$24 sps:$4 sm:$0xff]   ;;  %v2170_v32 = vld [vmem:[#allocation2 + $0xcc] ss:$24 sps:$4 sm:$0xff]  }
  0x47   :  { %1059 = vmatprep.mubr.bf16.mxu0 %v2086_v34  ;;  %1123 = vmatprep.mubr.bf16.mxu1 %v2088_v35  ;;  %v2174_v34 = vld [vmem:[#allocation2 + $0xc8] ss:$24 sps:$4 sm:$0xff]  }
  0x48   :  { %1806 = vmatpush3.bf16.msra.mxu1 %v2093_v36  ;;  %1918 = vmatpush3.bf16.msra.mxu0 %v2095_v37  ;;  %v2175_v35 = vld [vmem:[#allocation2 + $0xd0] ss:$24 sps:$4 sm:$0xff]   ;;  %v2176_v36 = vld [vmem:[#allocation2 + $0xfc] ss:$24 sps:$4 sm:$0xff]  }
  0x49   :  { %1807 = vmatprep.subr.bf16.mxu1 %v2102_v38  ;;  %1919 = vmatprep.subr.bf16.mxu0 %v2104_v39  ;;  %v2178_v37 = vld [vmem:[#allocation2 + $0x104] ss:$24 sps:$4 sm:$0xff]   ;;  %v2180_v38 = vld [vmem:[#allocation2 + $0xf8] ss:$24 sps:$4 sm:$0xff]  }
  0x4a   :  { %v2181_v39 = vld [vmem:[#allocation2 + $0x100] ss:$24 sps:$4 sm:$0xff]  }
  0x4c   :  { %1808 = vmatpush3.bf16.msra.mxu1 %v2103_v42  ;;  %1920 = vmatpush3.bf16.msra.mxu0 %v2105_v43  ;;  %v2186_v42 = vld [vmem:[#allocation2 + $0x128] ss:$24 sps:$4 sm:$0xff]  }
  0x4d   :  { %1809 = vmatprep.subr.bf16.mxu1 %v2112_v46  ;;  %1921 = vmatprep.subr.bf16.mxu0 %v2114_v48  ;;  %v2187_v43 = vld [vmem:[#allocation2 + $0x130] ss:$24 sps:$4 sm:$0xff]   ;;  %v2194_v48 = vld [vmem:[#allocation2 + $0x18c] ss:$24 sps:$4 sm:$0xff]  }
  0x4e   :  { %1060 = vmatmul.mubr.bf16.gmra.mxu0 %v2090_v40  ;;  %1124 = vmatmul.mubr.bf16.gmra.mxu1 %v2091_v41  ;;  %v2182_v40 = vld [vmem:[#allocation2 + $0x12c] ss:$24 sps:$4 sm:$0xff]   ;;  %v2192_v46 = vld [vmem:[#allocation2 + $0x158] ss:$24 sps:$4 sm:$0xff]  }
  0x4f   :  { %1067 = vmatprep.mubr.bf16.mxu0 %v2096_v44  ;;  %1131 = vmatprep.mubr.bf16.mxu1 %v2098_v45  ;;  %v2184_v41 = vld [vmem:[#allocation2 + $0x134] ss:$24 sps:$4 sm:$0xff]   ;;  %v2190_v45 = vld [vmem:[#allocation2 + $0x164] ss:$24 sps:$4 sm:$0xff]  }
  0x50   :  { %1810 = vmatpush3.bf16.msra.mxu1 %v2113_v47  ;;  %1922 = vmatpush3.bf16.msra.mxu0 %v2115_v49  ;;  %v2188_v44 = vld [vmem:[#allocation2 + $0x15c] ss:$24 sps:$4 sm:$0xff]   ;;  %v2193_v47 = vld [vmem:[#allocation2 + $0x160] ss:$24 sps:$4 sm:$0xff]  }
  0x51   :  { %1811 = vmatprep.subr.bf16.mxu1 %v2122_v52  ;;  %1923 = vmatprep.subr.bf16.mxu0 %v2124_v56  ;;  %v2196_v49 = vld [vmem:[#allocation2 + $0x194] ss:$24 sps:$4 sm:$0xff]  }
  0x52   :  { %v2200_v52 = vld [vmem:[#allocation2 + $0x1bc] ss:$24 sps:$4 sm:$0xff]   ;;  %v2206_v56 = vld [vmem:[#allocation2 + $0x1ec] ss:$24 sps:$4 sm:$0xff]  }
  0x54   :  { %1812 = vmatpush3.bf16.msra.mxu1 %v2123_v55  ;;  %1924 = vmatpush3.bf16.msra.mxu0 %v2125_v57  ;;  %v2205_v55 = vld [vmem:[#allocation2 + $0x1c0] ss:$24 sps:$4 sm:$0xff]   ;;  %v2208_v57 = vld [vmem:[#allocation2 + $0x1f4] ss:$24 sps:$4 sm:$0xff]  }
  0x55   :  { %1813 = vmatprep.subr.bf16.mxu1 %v2132_v58  ;;  %1925 = vmatprep.subr.bf16.mxu0 %v2134_v63  ;;  %v2210_v58 = vld [vmem:[#allocation2 + $0x1e8] ss:$24 sps:$4 sm:$0xff]  }
  0x56   :  { %1068 = vmatmul.mubr.bf16.gmra.mxu0 %v2100_v50  ;;  %1132 = vmatmul.mubr.bf16.gmra.mxu1 %v2101_v51  ;;  %v2198_v50 = vld [vmem:[#allocation2 + $0x188] ss:$24 sps:$4 sm:$0xff]  }
  0x57   :  { %1075 = vmatprep.mubr.bf16.mxu0 %v2106_v53  ;;  %1139 = vmatprep.mubr.bf16.mxu1 %v2108_v54  ;;  %v2199_v51 = vld [vmem:[#allocation2 + $0x190] ss:$24 sps:$4 sm:$0xff]   ;;  %v2202_v53 = vld [vmem:[#allocation2 + $0x1c4] ss:$24 sps:$4 sm:$0xff]   ;;  %v2217_v63 = vld [vmem:[#allocation2 + $0x220] ss:$24 sps:$4 sm:$0xff]  }
  0x58   :  { %1814 = vmatpush3.bf16.msra.mxu1 %v2133_v61  ;;  %1926 = vmatpush3.bf16.msra.mxu0 %v2135_v0  ;;  %v2204_v54 = vld [vmem:[#allocation2 + $0x1b8] ss:$24 sps:$4 sm:$0xff]   ;;  %v2214_v61 = vld [vmem:[#allocation2 + $0x224] ss:$24 sps:$4 sm:$0xff]  }
  0x59   :  { %1815 = vmatprep.subr.bf16.mxu1 %v2142_v2  ;;  %1927 = vmatprep.subr.bf16.mxu0 %v2144_v4  ;;  %v2218_v0 = vld [vmem:[#allocation2 + $0x24c] ss:$24 sps:$4 sm:$0xff]   ;;  %v2222_v2 = vld [vmem:[#allocation2 + $0x248] ss:$24 sps:$4 sm:$0xff]   ;;  %v2224_v4 = vld [vmem:[#allocation2 + $0x27c] ss:$24 sps:$4 sm:$0xff]  }
  0x5c   :  { %1816 = vmatpush3.bf16.msra.mxu1 %v2143_v3  ;;  %1928 = vmatpush3.bf16.msra.mxu0 %v2145_v5  ;;  %v2223_v3 = vld [vmem:[#allocation2 + $0x250] ss:$24 sps:$4 sm:$0xff]   ;;  %v2226_v5 = vld [vmem:[#allocation2 + $0x284] ss:$24 sps:$4 sm:$0xff]  }
  0x5e   :  { %1076 = vmatmul.mubr.bf16.gmra.mxu0 %v2110_v59  ;;  %1140 = vmatmul.mubr.bf16.gmra.mxu1 %v2111_v60  ;;  %v2211_v59 = vld [vmem:[#allocation2 + $0x1f0] ss:$24 sps:$4 sm:$0xff]   ;;  %v2212_v60 = vld [vmem:[#allocation2 + $0x21c] ss:$24 sps:$4 sm:$0xff]  }
  0x5f   :  { %1083 = vmatprep.mubr.bf16.mxu0 %v2116_v62  ;;  %1147 = vmatprep.mubr.bf16.mxu1 %v2118_v1  ;;  %v2216_v62 = vld [vmem:[#allocation2 + $0x218] ss:$24 sps:$4 sm:$0xff]   ;;  %v2220_v1 = vld [vmem:[#allocation2 + $0x254] ss:$24 sps:$4 sm:$0xff]  }
  0x66   :  { %1084 = vmatmul.mubr.bf16.gmra.mxu0 %v2120_v6  ;;  %1148 = vmatmul.mubr.bf16.gmra.mxu1 %v2121_v7  ;;  %v2228_v6 = vld [vmem:[#allocation2 + $0x278] ss:$24 sps:$4 sm:$0xff]  }
  0x67   :  { %1091 = vmatprep.mubr.bf16.mxu0 %v2126_v8  ;;  %1155 = vmatprep.mubr.bf16.mxu1 %v2128_v9  ;;  %v2229_v7 = vld [vmem:[#allocation2 + $0x280] ss:$24 sps:$4 sm:$0xff]   ;;  %v2230_v8 = vld [vmem:[#allocation2 + $0x2ac] ss:$24 sps:$4 sm:$0xff]  }
  0x68   :  { %v2232_v9 = vld [vmem:[#allocation2 + $0x2b4] ss:$24 sps:$4 sm:$0xff]  }
  0x6e   :  { %1092 = vmatmul.mubr.bf16.gmra.mxu0 %v2130_v10  ;;  %1156 = vmatmul.mubr.bf16.gmra.mxu1 %v2131_v11  ;;  %v2234_v10 = vld [vmem:[#allocation2 + $0x2a8] ss:$24 sps:$4 sm:$0xff]  }
  0x6f   :  { %1099 = vmatprep.mubr.bf16.mxu0 %v2136_v12  ;;  %1163 = vmatprep.mubr.bf16.mxu1 %v2138_v13  ;;  %v2235_v11 = vld [vmem:[#allocation2 + $0x2b0] ss:$24 sps:$4 sm:$0xff]   ;;  %v2236_v12 = vld [vmem:[#allocation2 + $0x2dc] ss:$24 sps:$4 sm:$0xff]  }
  0x70   :  { %v2238_v13 = vld [vmem:[#allocation2 + $0x2e4] ss:$24 sps:$4 sm:$0xff]  }
  0x76   :  { %1100 = vmatmul.mubr.bf16.gmra.mxu0 %v2140_v14  ;;  %1164 = vmatmul.mubr.bf16.gmra.mxu1 %v2141_v15  ;;  %v2240_v14 = vld [vmem:[#allocation2 + $0x2d8] ss:$24 sps:$4 sm:$0xff]  }
  0x77   :  { %1204 = vmatprep.mubr.bf16.mxu1 %v2148_v16  ;;  %1365 = vmatprep.mubr.bf16.mxu0 %v2151_v17  ;;  %v2241_v15 = vld [vmem:[#allocation2 + $0x2e0] ss:$24 sps:$4 sm:$0xff]  }
  0x7e   :  { %1205 = vmatmul.mubr.bf16.vlgmr.msra.gmra.mxu1 %v2146_v18  ;;  %1366 = vmatmul.mubr.bf16.vlgmr.msra.gmra.mxu0 %v2149_v19  ;;  %v2348_v18 = vld [vmem:[%s2529_s2] ss:$0 sm:$0xff]  ;;  %s2314_s2 = smov [#allocation7]  }
  0x7f   :  { %1212 = vmatprep.mubr.bf16.mxu1 %v2152_v20  ;;  %1373 = vmatprep.mubr.bf16.mxu0 %v2154_v21  ;;  %s1531_s26 = sshll.u32 %s2314_s2, 4  ;;  %s1532_s26 = int_to_ptr.vmem [resolvable:$true] %s1531_s26 }
  0x80   :  { %s2282_s27 = scalar_lea.vmem %s1532_s26, 4096  ;;  %p2287_p11 = scmp.lt.s32.totalorder %s1532_s26, %s1532_s26 }
  0x81   :  { %p2283_p10 = scmp.ne.s32.totalorder %s1532_s26, %s2282_s27  ;;  %p2288_p12 = scmp.lt.s32.totalorder %s2282_s27, %s2282_s27 }
  0x83   :  { %p2289_p13 = por %p2288_p12, %p2287_p11 }
  0x85   :  { %p2290_p0 = pnand %p2289_p13, %p2283_p10 }
  0x86   :  { %1213 = vmatmul.mubr.bf16.gmra.mxu1 %v2156_v22  ;;  %1374 = vmatmul.mubr.bf16.gmra.mxu0 %v2157_v23 }
  0x87   :  { %1220 = vmatprep.mubr.bf16.mxu1 %v2158_v24  ;;  %1381 = vmatprep.mubr.bf16.mxu0 %v2160_v25 }
  0x8e   :  { %1221 = vmatmul.mubr.bf16.gmra.mxu1 %v2162_v26  ;;  %1382 = vmatmul.mubr.bf16.gmra.mxu0 %v2163_v27 }
  0x8f   :  { %1228 = vmatprep.mubr.bf16.mxu1 %v2164_v28  ;;  %1389 = vmatprep.mubr.bf16.mxu0 %v2166_v29 }
  0x96   :  { %1229 = vmatmul.mubr.bf16.gmra.mxu1 %v2168_v30  ;;  %1390 = vmatmul.mubr.bf16.gmra.mxu0 %v2169_v31 }
  0x97   :  { %1236 = vmatprep.mubr.bf16.mxu1 %v2170_v32  ;;  %1397 = vmatprep.mubr.bf16.mxu0 %v2172_v33 }
  0x9e   :  { %1237 = vmatmul.mubr.bf16.gmra.mxu1 %v2174_v34  ;;  %1398 = vmatmul.mubr.bf16.gmra.mxu0 %v2175_v35 }
  0x9f   :  { %1244 = vmatprep.mubr.bf16.mxu1 %v2176_v36  ;;  %1405 = vmatprep.mubr.bf16.mxu0 %v2178_v37 }
  0xa6   :  { %1245 = vmatmul.mubr.bf16.gmra.mxu1 %v2180_v38  ;;  %1406 = vmatmul.mubr.bf16.gmra.mxu0 %v2181_v39 }
  0xa7   :  { %1252 = vmatprep.mubr.bf16.mxu1 %v2182_v40  ;;  %1413 = vmatprep.mubr.bf16.mxu0 %v2184_v41 }
  0xae   :  { %1253 = vmatmul.mubr.bf16.gmra.mxu1 %v2186_v42  ;;  %1414 = vmatmul.mubr.bf16.gmra.mxu0 %v2187_v43 }
  0xaf   :  { %1260 = vmatprep.mubr.bf16.mxu1 %v2188_v44  ;;  %1421 = vmatprep.mubr.bf16.mxu0 %v2190_v45 }
  0xb6   :  { %1261 = vmatmul.mubr.bf16.gmra.mxu1 %v2192_v46  ;;  %1422 = vmatmul.mubr.bf16.gmra.mxu0 %v2193_v47 }
  0xb7   :  { %1268 = vmatprep.mubr.bf16.mxu1 %v2194_v48  ;;  %1429 = vmatprep.mubr.bf16.mxu0 %v2196_v49 }
  0xbe   :  { %1269 = vmatmul.mubr.bf16.gmra.mxu1 %v2198_v50  ;;  %1430 = vmatmul.mubr.bf16.gmra.mxu0 %v2199_v51 }
  0xbf   :  { %1276 = vmatprep.mubr.bf16.mxu1 %v2200_v52  ;;  %1437 = vmatprep.mubr.bf16.mxu0 %v2202_v53 }
  0xc6   :  { %1277 = vmatmul.mubr.bf16.gmra.mxu1 %v2204_v54  ;;  %1438 = vmatmul.mubr.bf16.gmra.mxu0 %v2205_v55 }
  0xc7   :  { %1284 = vmatprep.mubr.bf16.mxu1 %v2206_v56  ;;  %1445 = vmatprep.mubr.bf16.mxu0 %v2208_v57 }
  0xce   :  { %1285 = vmatmul.mubr.bf16.gmra.mxu1 %v2210_v58  ;;  %1446 = vmatmul.mubr.bf16.gmra.mxu0 %v2211_v59 }
  0xcf   :  { %1292 = vmatprep.mubr.bf16.mxu1 %v2212_v60  ;;  %1453 = vmatprep.mubr.bf16.mxu0 %v2214_v61 }
  0xd6   :  { %1293 = vmatmul.mubr.bf16.gmra.mxu1 %v2216_v62  ;;  %1454 = vmatmul.mubr.bf16.gmra.mxu0 %v2217_v63 }
  0xd7   :  { %1300 = vmatprep.mubr.bf16.mxu1 %v2218_v0  ;;  %1461 = vmatprep.mubr.bf16.mxu0 %v2220_v1 }
  0xde   :  { %1301 = vmatmul.mubr.bf16.gmra.mxu1 %v2222_v2  ;;  %1462 = vmatmul.mubr.bf16.gmra.mxu0 %v2223_v3 }
  0xdf   :  { %1308 = vmatprep.mubr.bf16.mxu1 %v2224_v4  ;;  %1469 = vmatprep.mubr.bf16.mxu0 %v2226_v5 }
  0xe6   :  { %1309 = vmatmul.mubr.bf16.gmra.mxu1 %v2228_v6  ;;  %1470 = vmatmul.mubr.bf16.gmra.mxu0 %v2229_v7 }
  0xe7   :  { %1316 = vmatprep.mubr.bf16.mxu1 %v2230_v8  ;;  %1477 = vmatprep.mubr.bf16.mxu0 %v2232_v9 }
  0xee   :  { %1317 = vmatmul.mubr.bf16.gmra.mxu1 %v2234_v10  ;;  %1478 = vmatmul.mubr.bf16.gmra.mxu0 %v2235_v11 }
  0xef   :  { %1324 = vmatprep.mubr.bf16.mxu1 %v2236_v12  ;;  %1485 = vmatprep.mubr.bf16.mxu0 %v2238_v13 }
  0xf6   :  { %1325 = vmatmul.mubr.bf16.gmra.mxu1 %v2240_v14  ;;  %1486 = vmatmul.mubr.bf16.gmra.mxu0 %v2241_v15 }
  0xfe   :  { %v2343_v16 = vpop.f32.mrf.mxu0  ;;  %v1753_v17 = vpop.f32.mrf.mxu1 }
 0x100   :  { %v2350_v19 = vpop.f32.mrf.mxu0  ;;  %v1754_v20 = vpop.f32.mrf.mxu1 }
 0x101   :  { %v1755_v21 = vadd.f32 %v1754_v20, %v1753_v17 }
 0x102   :  { %v2352_v22 = vpop.f32.mrf.mxu0  ;;  %v1756_v23 = vpop.f32.mrf.mxu1 }
 0x103   :  { %v2355_v24 = vadd.f32 %v1755_v21, %v2348_v18 }
 0x104   :  { %v2357_v25 = vpop.f32.mrf.mxu0  ;;  %v1757_v26 = vpop.f32.mrf.mxu1 }
 0x105   :  { %v1758_v27 = vadd.f32 %v1757_v26, %v1756_v23 }
 0x106   :  { %v2359_v28 = vpop.f32.mrf.mxu0  ;;  %v1759_v29 = vpop.f32.mrf.mxu1 }
 0x107   :  { %v2362_v30 = vadd.f32 %v1758_v27, %v2348_v18 }
 0x108   :  { %v2364_v31 = vpop.f32.mrf.mxu0  ;;  %v1760_v32 = vpop.f32.mrf.mxu1 }
 0x109   :  { %v1761_v33 = vadd.f32 %v1760_v32, %v1759_v29 }
 0x10a   :  { %v2366_v34 = vpop.f32.mrf.mxu0  ;;  %v1762_v35 = vpop.f32.mrf.mxu1 }
 0x10b   :  { %v2369_v36 = vadd.f32 %v1761_v33, %v2348_v18 }
 0x10c   :  { %v2371_v37 = vpop.f32.mrf.mxu0  ;;  %v1763_v38 = vpop.f32.mrf.mxu1 }
 0x10d   :  { %v1764_v39 = vadd.f32 %v1763_v38, %v1762_v35 }
 0x10e   :  { %v2373_v40 = vpop.f32.mrf.mxu0  ;;  %v1765_v41 = vpop.f32.mrf.mxu1 }
 0x10f   :  { %v2376_v42 = vadd.f32 %v1764_v39, %v2348_v18 }
 0x110   :  { %v2378_v43 = vpop.f32.mrf.mxu0  ;;  %v1766_v44 = vpop.f32.mrf.mxu1 }
 0x111   :  { %v1767_v45 = vadd.f32 %v1766_v44, %v1765_v41 }
 0x112   :  { %v2380_v46 = vpop.f32.mrf.mxu0  ;;  %v1768_v47 = vpop.f32.mrf.mxu1 }
 0x113   :  { %v2383_v48 = vadd.f32 %v1767_v45, %v2348_v18 }
 0x114   :  { %v2385_v49 = vpop.f32.mrf.mxu0  ;;  %v1769_v50 = vpop.f32.mrf.mxu1 }
 0x115   :  { %v1770_v51 = vadd.f32 %v1769_v50, %v1768_v47 }
 0x116   :  { %v2387_v52 = vpop.f32.mrf.mxu0  ;;  %v1771_v53 = vpop.f32.mrf.mxu1 }
 0x117   :  { %v2390_v54 = vadd.f32 %v1770_v51, %v2348_v18 }
 0x118   :  { %v2392_v55 = vpop.f32.mrf.mxu0  ;;  %v1772_v56 = vpop.f32.mrf.mxu1 }
 0x119   :  { %v1773_v57 = vadd.f32 %v1772_v56, %v1771_v53 }
 0x11a   :  { %v2394_v58 = vpop.f32.mrf.mxu0  ;;  %v1774_v59 = vpop.f32.mrf.mxu1 }
 0x11b   :  { %v2397_v60 = vadd.f32 %v1773_v57, %v2348_v18 }
 0x11c   :  { %v2399_v61 = vpop.f32.mrf.mxu0  ;;  %v1775_v62 = vpop.f32.mrf.mxu1 }
 0x11d   :  { %v1776_v63 = vadd.f32 %v1775_v62, %v1774_v59 }
 0x11e   :  { %v2401_v0 = vpop.f32.mrf.mxu0  ;;  %v1777_v1 = vpop.f32.mrf.mxu1 }
 0x11f   :  { %v2404_v2 = vadd.f32 %v1776_v63, %v2348_v18 }
 0x120   :  { %v2406_v3 = vpop.f32.mrf.mxu0  ;;  %v1778_v4 = vpop.f32.mrf.mxu1 }
 0x121   :  { %v1779_v5 = vadd.f32 %v1778_v4, %v1777_v1 }
 0x122   :  { %v2408_v6 = vpop.f32.mrf.mxu0  ;;  %v1780_v7 = vpop.f32.mrf.mxu1 }
 0x123   :  { %v2411_v8 = vadd.f32 %v1779_v5, %v2348_v18 }
 0x124   :  { %v2413_v9 = vpop.f32.mrf.mxu0  ;;  %v1781_v10 = vpop.f32.mrf.mxu1 }
 0x125   :  { %v1782_v11 = vadd.f32 %v1781_v10, %v1780_v7 }
 0x126   :  { %v2415_v12 = vpop.f32.mrf.mxu0  ;;  %v1783_v13 = vpop.f32.mrf.mxu1 }
 0x127   :  { %v2418_v14 = vadd.f32 %v1782_v11, %v2348_v18 }
 0x128   :  { %v2420_v15 = vpop.f32.mrf.mxu0  ;;  %v1784_v17 = vpop.f32.mrf.mxu1 }
 0x129   :  { %v1785_v20 = vadd.f32 %v1784_v17, %v1783_v13  ;;  %v1707_v17 = vadd.f32 %v2350_v19, %v2343_v16 }
 0x12a   :  { %v2422_v21 = vpop.f32.mrf.mxu0  ;;  %v1786_v23 = vpop.f32.mrf.mxu1 }
 0x12b   :  { %v2425_v26 = vadd.f32 %v1785_v20, %v2348_v18 }
 0x12c   :  { %v2427_v27 = vpop.f32.mrf.mxu0  ;;  %v1787_v29 = vpop.f32.mrf.mxu1 }
 0x12d   :  { %v1788_v32 = vadd.f32 %v1787_v29, %v1786_v23 }
 0x12e   :  { %v2429_v33 = vpop.f32.mrf.mxu0  ;;  %v1789_v35 = vpop.f32.mrf.mxu1 }
 0x12f   :  { %v2432_v38 = vadd.f32 %v1788_v32, %v2348_v18 }
 0x130   :  { %v2434_v39 = vpop.f32.mrf.mxu0  ;;  %v1790_v41 = vpop.f32.mrf.mxu1 }
 0x131   :  { %v1791_v44 = vadd.f32 %v1790_v41, %v1789_v35 }
 0x132   :  { %v2436_v45 = vpop.f32.mrf.mxu0  ;;  %v1792_v47 = vpop.f32.mrf.mxu1 }
 0x133   :  { %v2439_v50 = vadd.f32 %v1791_v44, %v2348_v18  ;;  %v1046_v44 = vadd.f32 %v1707_v17, %v2348_v18 }
 0x134   :  { %v2441_v51 = vpop.f32.mrf.mxu0  ;;  %v1793_v53 = vpop.f32.mrf.mxu1 }
 0x135   :  { %2531 = vst [vmem:[#allocation11_spill] sm:$0xff] %v2439_v50  ;;  %v1794_v56 = vadd.f32 %v1793_v53, %v1792_v47  ;;  %v1710_v47 = vadd.f32 %v2357_v25, %v2352_v22 }
 0x136   :  { %v2443_v57 = vpop.f32.mrf.mxu0  ;;  %v1795_v59 = vpop.f32.mrf.mxu1 }
 0x137   :  { %v2446_v62 = vadd.f32 %v1794_v56, %v2348_v18  ;;  %v1049_v19 = vadd.f32 %v1710_v47, %v2348_v18 }
 0x138   :  { %v2448_v63 = vpop.f32.mrf.mxu0  ;;  %v1796_v1 = vpop.f32.mrf.mxu1 }
 0x139   :  { %2532 = vst [vmem:[#allocation12_spill] sm:$0xff] %v2446_v62  ;;  %v1797_v4 = vadd.f32 %v1796_v1, %v1795_v59 }
 0x13a   :  { %v2450_v5 = vpop.f32.mrf.mxu0  ;;  %v1798_v7 = vpop.f32.mrf.mxu1 }
 0x13b   :  { %v2453_v10 = vadd.f32 %v1797_v4, %v2348_v18 }
 0x13c   :  { %v2455_v11 = vpop.f32.mrf.mxu0  ;;  %v1799_v13 = vpop.f32.mrf.mxu1 }
 0x13d   :  { %2533 = vst [vmem:[#allocation13_spill] sm:$0xff] %v2453_v10  ;;  %v1800_v20 = vadd.f32 %v1799_v13, %v1798_v7  ;;  %v1713_v7 = vadd.f32 %v2364_v31, %v2359_v28 }
 0x13e   :  { %v1817_v23 = vpop.f32.mrf.mxu1  ;;  %v1929_v29 = vpop.f32.mrf.mxu0 }
 0x13f   :  { %v2460_v32 = vadd.f32 %v1800_v20, %v2348_v18 }
 0x140   :  { %v1818_v35 = vpop.f32.mrf.mxu1  ;;  %v1930_v41 = vpop.f32.mrf.mxu0 }
 0x141   :  { %2534 = vst [vmem:[#allocation14_spill] sm:$0xff] %v2460_v32  ;;  %v1819_v53 = vadd.f32 %v1818_v35, %v1817_v23  ;;  %v1931_v4 = vadd.f32 %v1930_v41, %v1929_v29  ;;  %v1054_v23 = vadd.f32 %v1713_v7, %v2348_v18  ;;  %v1716_v29 = vadd.f32 %v2371_v37, %v2366_v34 }
 0x142   :  { %v1820_v56 = vpop.f32.mrf.mxu1  ;;  %v1932_v59 = vpop.f32.mrf.mxu0 }
 0x143   :  { %v1207_v1 = vadd.f32 %v1819_v53, %v1046_v44 }
 0x144   :  { %v1821_v10 = vpop.f32.mrf.mxu1  ;;  %v1933_v16 = vpop.f32.mrf.mxu0 }
 0x145   :  { %v1368_v13 = vadd.f32 %v1931_v4, %v1207_v1  ;;  %v1822_v20 = vadd.f32 %v1821_v10, %v1820_v56  ;;  %v1934_v50 = vadd.f32 %v1933_v16, %v1932_v59  ;;  %v1057_v56 = vadd.f32 %v1716_v29, %v2348_v18 }
 0x146   :  { %v1823_v32 = vpop.f32.mrf.mxu1  ;;  %v1935_v62 = vpop.f32.mrf.mxu0  ;;  %v1719_v59 = vadd.f32 %v2378_v43, %v2373_v40 }
 0x147   :  { %1494 = vst [vmem:[#allocation7] sm:$0xff] %v1368_v13  ;;  %v1210_v17 = vadd.f32 %v1822_v20, %v1049_v19 }
 0x148   :  { %v1824_v22 = vpop.f32.mrf.mxu1  ;;  %v1936_v25 = vpop.f32.mrf.mxu0  ;;  %v1062_v7 = vadd.f32 %v1719_v59, %v2348_v18 }
 0x149   :  { %v1371_v35 = vadd.f32 %v1934_v50, %v1210_v17  ;;  %v1825_v41 = vadd.f32 %v1824_v22, %v1823_v32  ;;  %v1937_v31 = vadd.f32 %v1936_v25, %v1935_v62  ;;  %v1722_v62 = vadd.f32 %v2385_v49, %v2380_v46 }
 0x14a   :  { %v1826_v44 = vpop.f32.mrf.mxu1  ;;  %v1938_v47 = vpop.f32.mrf.mxu0 }
 0x14b   :  { %1495 = vst [vmem:[#allocation7 + $0x8] sm:$0xff] %v1371_v35  ;;  %v1215_v28 = vadd.f32 %v1825_v41, %v1054_v23  ;;  %v1065_v29 = vadd.f32 %v1722_v62, %v2348_v18  ;;  %v1725_v35 = vadd.f32 %v2392_v55, %v2387_v52 }
 0x14c   :  { %v1827_v10 = vpop.f32.mrf.mxu1  ;;  %v1939_v53 = vpop.f32.mrf.mxu0 }
 0x14d   :  { %v1376_v1 = vadd.f32 %v1937_v31, %v1215_v28  ;;  %v1828_v4 = vadd.f32 %v1827_v10, %v1826_v44  ;;  %v1940_v37 = vadd.f32 %v1939_v53, %v1938_v47  ;;  %v1070_v53 = vadd.f32 %v1725_v35, %v2348_v18 }
 0x14e   :  { %v1829_v16 = vpop.f32.mrf.mxu1  ;;  %v1941_v19 = vpop.f32.mrf.mxu0 }
 0x14f   :  { %1496 = vst [vmem:[#allocation7 + $0x10] sm:$0xff] %v1376_v1  ;;  %v1218_v34 = vadd.f32 %v1828_v4, %v1057_v56  ;;  %v1728_v56 = vadd.f32 %v2399_v61, %v2394_v58 }
 0x150   :  { %v1830_v50 = vpop.f32.mrf.mxu1  ;;  %v1942_v32 = vpop.f32.mrf.mxu0 }
 0x151   :  { %v1379_v13 = vadd.f32 %v1940_v37, %v1218_v34  ;;  %v1831_v20 = vadd.f32 %v1830_v50, %v1829_v16  ;;  %v1943_v43 = vadd.f32 %v1942_v32, %v1941_v19  ;;  %v1073_v37 = vadd.f32 %v1728_v56, %v2348_v18 }
 0x152   :  { %v1832_v17 = vpop.f32.mrf.mxu1  ;;  %v1944_v22 = vpop.f32.mrf.mxu0  ;;  %v1731_v50 = vadd.f32 %v2406_v3, %v2401_v0 }
 0x153   :  { %1497 = vst [vmem:[#allocation7 + $0x18] sm:$0xff] %v1379_v13  ;;  %v1223_v40 = vadd.f32 %v1831_v20, %v1062_v7 }
 0x154   :  { %v1833_v25 = vpop.f32.mrf.mxu1  ;;  %v1945_v23 = vpop.f32.mrf.mxu0 }
 0x155   :  { %v1384_v41 = vadd.f32 %v1943_v43, %v1223_v40  ;;  %v1834_v44 = vadd.f32 %v1833_v25, %v1832_v17  ;;  %v1946_v49 = vadd.f32 %v1945_v23, %v1944_v22  ;;  %v1078_v22 = vadd.f32 %v1731_v50, %v2348_v18 }
 0x156   :  { %v1835_v47 = vpop.f32.mrf.mxu1  ;;  %v1947_v28 = vpop.f32.mrf.mxu0  ;;  %v1734_v40 = vadd.f32 %v2413_v9, %v2408_v6 }
 0x157   :  { %1498 = vst [vmem:[#allocation7 + $0x20] sm:$0xff] %v1384_v41  ;;  %v1226_v46 = vadd.f32 %v1834_v44, %v1065_v29 }
 0x158   :  { %v1836_v31 = vpop.f32.mrf.mxu1  ;;  %v1948_v10 = vpop.f32.mrf.mxu0  ;;  %v1081_v44 = vadd.f32 %v1734_v40, %v2348_v18 }
 0x159   :  { %v1387_v59 = vadd.f32 %v1946_v49, %v1226_v46  ;;  %v1837_v1 = vadd.f32 %v1836_v31, %v1835_v47  ;;  %v1949_v55 = vadd.f32 %v1948_v10, %v1947_v28  ;;  %v1737_v47 = vadd.f32 %v2420_v15, %v2415_v12 }
 0x15a   :  { %v1838_v4 = vpop.f32.mrf.mxu1  ;;  %v1950_v16 = vpop.f32.mrf.mxu0 }
 0x15b   :  { %1499 = vst [vmem:[#allocation7 + $0x28] sm:$0xff] %v1387_v59  ;;  %v1231_v52 = vadd.f32 %v1837_v1, %v1070_v53  ;;  %v1086_v56 = vadd.f32 %v1737_v47, %v2348_v18  ;;  %v1740_v59 = vadd.f32 %v2427_v27, %v2422_v21 }
 0x15c   :  { %v1839_v19 = vpop.f32.mrf.mxu1  ;;  %v1951_v34 = vpop.f32.mrf.mxu0 }
 0x15d   :  { %v1392_v32 = vadd.f32 %v1949_v55, %v1231_v52  ;;  %v1840_v7 = vadd.f32 %v1839_v19, %v1838_v4  ;;  %v1952_v61 = vadd.f32 %v1951_v34, %v1950_v16  ;;  %v1089_v34 = vadd.f32 %v1740_v59, %v2348_v18 }
 0x15e   :  { %v1841_v62 = vpop.f32.mrf.mxu1  ;;  %v1953_v13 = vpop.f32.mrf.mxu0 }
 0x15f   :  { %1500 = vst [vmem:[#allocation7 + $0x30] sm:$0xff] %v1392_v32  ;;  %v1234_v58 = vadd.f32 %v1840_v7, %v1073_v37  ;;  %v1743_v37 = vadd.f32 %v2434_v39, %v2429_v33 }
 0x160   :  { %v1842_v20 = vpop.f32.mrf.mxu1  ;;  %v1954_v17 = vpop.f32.mrf.mxu0 }
 0x161   :  { %v1395_v43 = vadd.f32 %v1952_v61, %v1234_v58  ;;  %v1843_v25 = vadd.f32 %v1842_v20, %v1841_v62  ;;  %v1955_v3 = vadd.f32 %v1954_v17, %v1953_v13  ;;  %v1094_v61 = vadd.f32 %v1743_v37, %v2348_v18 }
 0x162   :  { %v1844_v23 = vpop.f32.mrf.mxu1  ;;  %v1956_v29 = vpop.f32.mrf.mxu0  ;;  %v1746_v20 = vadd.f32 %v2441_v51, %v2436_v45 }
 0x163   :  { %1501 = vst [vmem:[#allocation7 + $0x38] sm:$0xff] %v1395_v43  ;;  %v1239_v0 = vadd.f32 %v1843_v25, %v1078_v22 }
 0x164   :  { %v1845_v35 = vpop.f32.mrf.mxu1  ;;  %v1957_v41 = vpop.f32.mrf.mxu0 }
 0x165   :  { %v1400_v28 = vadd.f32 %v1955_v3, %v1239_v0  ;;  %v1846_v46 = vadd.f32 %v1845_v35, %v1844_v23  ;;  %v1958_v9 = vadd.f32 %v1957_v41, %v1956_v29  ;;  %v1097_v29 = vadd.f32 %v1746_v20, %v2348_v18 }
 0x166   :  { %v1847_v49 = vpop.f32.mrf.mxu1  ;;  %v1959_v31 = vpop.f32.mrf.mxu0  ;;  %v1749_v0 = vadd.f32 %v2448_v63, %v2443_v57 }
 0x167   :  { %1502 = vst [vmem:[#allocation7 + $0x40] sm:$0xff] %v1400_v28  ;;  %v1242_v6 = vadd.f32 %v1846_v46, %v1081_v44 }
 0x168   :  { %v1848_v10 = vpop.f32.mrf.mxu1  ;;  %v1960_v53 = vpop.f32.mrf.mxu0  ;;  %v1102_v46 = vadd.f32 %v1749_v0, %v2348_v18 }
 0x169   :  { %v1403_v1 = vadd.f32 %v1958_v9, %v1242_v6  ;;  %v1849_v4 = vadd.f32 %v1848_v10, %v1847_v49  ;;  %v1961_v15 = vadd.f32 %v1960_v53, %v1959_v31  ;;  %v1752_v49 = vadd.f32 %v2455_v11, %v2450_v5 }
 0x16a   :  { %v1850_v16 = vpop.f32.mrf.mxu1  ;;  %v1962_v52 = vpop.f32.mrf.mxu0 }
 0x16b   :  { %1503 = vst [vmem:[#allocation7 + $0x48] sm:$0xff] %v1403_v1  ;;  %v1247_v12 = vadd.f32 %v1849_v4, %v1086_v56  ;;  %v1105_v59 = vadd.f32 %v1752_v49, %v2348_v18 }
 0x16c   :  { %v1851_v55 = vpop.f32.mrf.mxu1  ;;  %v1963_v19 = vpop.f32.mrf.mxu0 }
 0x16d   :  { %v1408_v50 = vadd.f32 %v1961_v15, %v1247_v12  ;;  %v1852_v32 = vadd.f32 %v1851_v55, %v1850_v16  ;;  %v1964_v27 = vadd.f32 %v1963_v19, %v1962_v52 }
 0x16e   :  { %v1853_v7 = vpop.f32.mrf.mxu1  ;;  %v1965_v62 = vpop.f32.mrf.mxu0 }
 0x16f   :  { %1504 = vst [vmem:[#allocation7 + $0x50] sm:$0xff] %v1408_v50  ;;  %v1250_v21 = vadd.f32 %v1852_v32, %v1089_v34 }
 0x170   :  { %v1854_v13 = vpop.f32.mrf.mxu1  ;;  %v1966_v58 = vpop.f32.mrf.mxu0 }
 0x171   :  { %v1411_v17 = vadd.f32 %v1964_v27, %v1250_v21  ;;  %v1855_v22 = vadd.f32 %v1854_v13, %v1853_v7  ;;  %v1967_v39 = vadd.f32 %v1966_v58, %v1965_v62 }
 0x172   :  { %v1856_v40 = vpop.f32.mrf.mxu1  ;;  %v1968_v43 = vpop.f32.mrf.mxu0 }
 0x173   :  { %1505 = vst [vmem:[#allocation7 + $0x58] sm:$0xff] %v1411_v17  ;;  %v1255_v33 = vadd.f32 %v1855_v22, %v1094_v61 }
 0x174   :  { %v1857_v25 = vpop.f32.mrf.mxu1  ;;  %v1969_v23 = vpop.f32.mrf.mxu0 }
 0x175   :  { %v1416_v3 = vadd.f32 %v1967_v39, %v1255_v33  ;;  %v1858_v35 = vadd.f32 %v1857_v25, %v1856_v40  ;;  %v1970_v51 = vadd.f32 %v1969_v23, %v1968_v43 }
 0x176   :  { %v1859_v41 = vpop.f32.mrf.mxu1  ;;  %v1971_v44 = vpop.f32.mrf.mxu0 }
 0x177   :  { %1506 = vst [vmem:[#allocation7 + $0x60] sm:$0xff] %v1416_v3  ;;  %v1258_v45 = vadd.f32 %v1858_v35, %v1097_v29 }
 0x178   :  { %v1860_v47 = vpop.f32.mrf.mxu1  ;;  %v1972_v28 = vpop.f32.mrf.mxu0 }
 0x179   :  { %v1419_v31 = vadd.f32 %v1970_v51, %v1258_v45  ;;  %v1861_v6 = vadd.f32 %v1860_v47, %v1859_v41  ;;  %v1973_v63 = vadd.f32 %v1972_v28, %v1971_v44 }
 0x17a   :  { %v1862_v9 = vpop.f32.mrf.mxu1  ;;  %v1974_v10 = vpop.f32.mrf.mxu0 }
 0x17b   :  { %1507 = vst [vmem:[#allocation7 + $0x68] sm:$0xff] %v1419_v31  ;;  %v1263_v57 = vadd.f32 %v1861_v6, %v1102_v46 }
 0x17c   :  { %v1863_v53 = vpop.f32.mrf.mxu1  ;;  %v1975_v56 = vpop.f32.mrf.mxu0 }
 0x17d   :  { %v1424_v1 = vadd.f32 %v1973_v63, %v1263_v57  ;;  %v1864_v4 = vadd.f32 %v1863_v53, %v1862_v9  ;;  %v1976_v15 = vadd.f32 %v1975_v56, %v1974_v10 }
 0x17e   :  { %v1865_v16 = vpop.f32.mrf.mxu1  ;;  %v1977_v52 = vpop.f32.mrf.mxu0 }
 0x17f   :  { %1508 = vst [vmem:[#allocation7 + $0x70] sm:$0xff] %v1424_v1  ;;  %v1266_v12 = vadd.f32 %v1864_v4, %v1105_v59 }
 0x180   :  { %v1866_v55 = vpop.f32.mrf.mxu1  ;;  %v1978_v5 = vpop.f32.mrf.mxu0 }
 0x181   :  { %v1427_v11 = vadd.f32 %v1976_v15, %v1266_v12  ;;  %v1867_v19 = vadd.f32 %v1866_v55, %v1865_v16  ;;  %v1979_v32 = vadd.f32 %v1978_v5, %v1977_v52 }
 0x182   :  { %v1868_v34 = vpop.f32.mrf.mxu1  ;;  %v1980_v37 = vpop.f32.mrf.mxu0 }
 0x183   :  { %1509 = vst [vmem:[#allocation7 + $0x78] sm:$0xff] %v1427_v11  ;;  %v1271_v50 = vadd.f32 %v1867_v19, %v2355_v24 }
 0x184   :  { %v1869_v7 = vpop.f32.mrf.mxu1  ;;  %v1981_v62 = vpop.f32.mrf.mxu0 }
 0x185   :  { %v1432_v18 = vadd.f32 %v1979_v32, %v1271_v50  ;;  %v1870_v21 = vadd.f32 %v1869_v7, %v1868_v34  ;;  %v1982_v61 = vadd.f32 %v1981_v62, %v1980_v37 }
 0x186   :  { %v1871_v27 = vpop.f32.mrf.mxu1  ;;  %v1983_v13 = vpop.f32.mrf.mxu0 }
 0x187   :  { %1510 = vst [vmem:[#allocation7 + $0x80] sm:$0xff] %v1432_v18  ;;  %v1274_v58 = vadd.f32 %v1870_v21, %v2362_v30 }
 0x188   :  { %v1872_v20 = vpop.f32.mrf.mxu1  ;;  %v1984_v17 = vpop.f32.mrf.mxu0 }
 0x189   :  { %v1435_v22 = vadd.f32 %v1982_v61, %v1274_v58  ;;  %v1873_v40 = vadd.f32 %v1872_v20, %v1871_v27  ;;  %v1985_v39 = vadd.f32 %v1984_v17, %v1983_v13 }
 0x18a   :  { %v1874_v43 = vpop.f32.mrf.mxu1  ;;  %v1986_v33 = vpop.f32.mrf.mxu0 }
 0x18b   :  { %1511 = vst [vmem:[#allocation7 + $0x88] sm:$0xff] %v1435_v22  ;;  %v1279_v24 = vadd.f32 %v1873_v40, %v2369_v36 }
 0x18c   :  { %v1875_v25 = vpop.f32.mrf.mxu1  ;;  %v1987_v23 = vpop.f32.mrf.mxu0 }
 0x18d   :  { %v1440_v29 = vadd.f32 %v1985_v39, %v1279_v24  ;;  %v1876_v0 = vadd.f32 %v1875_v25, %v1874_v43  ;;  %v1988_v41 = vadd.f32 %v1987_v23, %v1986_v33 }
 0x18e   :  { %v1877_v3 = vpop.f32.mrf.mxu1  ;;  %v1989_v35 = vpop.f32.mrf.mxu0 }
 0x18f   :  { %1512 = vst [vmem:[#allocation7 + $0x90] sm:$0xff] %v1440_v29  ;;  %v1282_v30 = vadd.f32 %v1876_v0, %v2376_v42 }
 0x190   :  { %v1878_v44 = vpop.f32.mrf.mxu1  ;;  %v1990_v45 = vpop.f32.mrf.mxu0 }
 0x191   :  { %v1443_v51 = vadd.f32 %v1988_v41, %v1282_v30  ;;  %v1879_v47 = vadd.f32 %v1878_v44, %v1877_v3  ;;  %v1991_v49 = vadd.f32 %v1990_v45, %v1989_v35 }
 0x192   :  { %v1880_v28 = vpop.f32.mrf.mxu1  ;;  %v1992_v46 = vpop.f32.mrf.mxu0 }
 0x193   :  { %1513 = vst [vmem:[#allocation7 + $0x98] sm:$0xff] %v1443_v51  ;;  %v1287_v36 = vadd.f32 %v1879_v47, %v2383_v48 }
 0x194   :  { %v1881_v31 = vpop.f32.mrf.mxu1  ;;  %v1993_v6 = vpop.f32.mrf.mxu0 }
 0x195   :  { %v1448_v9 = vadd.f32 %v1991_v49, %v1287_v36  ;;  %v1882_v10 = vadd.f32 %v1881_v31, %v1880_v28  ;;  %v1994_v53 = vadd.f32 %v1993_v6, %v1992_v46  ;;  %v2535_v31 = vld [vmem:[#allocation11_spill] sm:$0xff] }
 0x196   :  { %v1883_v57 = vpop.f32.mrf.mxu1  ;;  %v1995_v63 = vpop.f32.mrf.mxu0 }
 0x197   :  { %1514 = vst [vmem:[#allocation7 + $0xa0] sm:$0xff] %v1448_v9  ;;  %v1290_v42 = vadd.f32 %v1882_v10, %v2390_v54 }
 0x198   :  { %v1884_v56 = vpop.f32.mrf.mxu1  ;;  %v1996_v59 = vpop.f32.mrf.mxu0 }
 0x199   :  { %v1451_v1 = vadd.f32 %v1994_v53, %v1290_v42  ;;  %v1885_v4 = vadd.f32 %v1884_v56, %v1883_v57  ;;  %v1997_v12 = vadd.f32 %v1996_v59, %v1995_v63  ;;  %v2536_v56 = vld [vmem:[#allocation12_spill] sm:$0xff] }
 0x19a   :  { %v1886_v16 = vpop.f32.mrf.mxu1  ;;  %v1998_v52 = vpop.f32.mrf.mxu0 }
 0x19b   :  { %1515 = vst [vmem:[#allocation7 + $0xa8] sm:$0xff] %v1451_v1  ;;  %v1295_v48 = vadd.f32 %v1885_v4, %v2397_v60 }
 0x19c   :  { %v1887_v15 = vpop.f32.mrf.mxu1  ;;  %v1999_v55 = vpop.f32.mrf.mxu0 }
 0x19d   :  { %v1456_v5 = vadd.f32 %v1997_v12, %v1295_v48  ;;  %v1888_v11 = vadd.f32 %v1887_v15, %v1886_v16  ;;  %v2000_v37 = vadd.f32 %v1999_v55, %v1998_v52  ;;  %v2537_v15 = vld [vmem:[#allocation13_spill] sm:$0xff] }
 0x19e   :  { %v1889_v19 = vpop.f32.mrf.mxu1  ;;  %v2001_v34 = vpop.f32.mrf.mxu0 }
 0x19f   :  { %1516 = vst [vmem:[#allocation7 + $0xb0] sm:$0xff] %v1456_v5  ;;  %v1298_v54 = vadd.f32 %v1888_v11, %v2404_v2 }
 0x1a0   :  { %v1890_v50 = vpop.f32.mrf.mxu1  ;;  %v2002_v32 = vpop.f32.mrf.mxu0 }
 0x1a1   :  { %v1459_v7 = vadd.f32 %v2000_v37, %v1298_v54  ;;  %v1891_v62 = vadd.f32 %v1890_v50, %v1889_v19  ;;  %v2003_v27 = vadd.f32 %v2002_v32, %v2001_v34  ;;  %v2538_v37 = vld [vmem:[#allocation14_spill] sm:$0xff] }
 0x1a2   :  { %v1892_v18 = vpop.f32.mrf.mxu1  ;;  %v2004_v21 = vpop.f32.mrf.mxu0 }
 0x1a3   :  { %1517 = vst [vmem:[#allocation7 + $0xb8] sm:$0xff] %v1459_v7  ;;  %v1303_v60 = vadd.f32 %v1891_v62, %v2411_v8 }
 0x1a4   :  { %v1893_v13 = vpop.f32.mrf.mxu1  ;;  %v2005_v58 = vpop.f32.mrf.mxu0 }
 0x1a5   :  { %v1464_v61 = vadd.f32 %v2003_v27, %v1303_v60  ;;  %v1894_v20 = vadd.f32 %v1893_v13, %v1892_v18  ;;  %v2006_v40 = vadd.f32 %v2005_v58, %v2004_v21 }
 0x1a6   :  { %v1895_v17 = vpop.f32.mrf.mxu1  ;;  %v2007_v22 = vpop.f32.mrf.mxu0 }
 0x1a7   :  { %1518 = vst [vmem:[#allocation7 + $0xc0] sm:$0xff] %v1464_v61  ;;  %v1306_v2 = vadd.f32 %v1894_v20, %v2418_v14 }
 0x1a8   :  { %v1896_v43 = vpop.f32.mrf.mxu1  ;;  %v2008_v33 = vpop.f32.mrf.mxu0 }
 0x1a9   :  { %v1467_v24 = vadd.f32 %v2006_v40, %v1306_v2  ;;  %v1897_v39 = vadd.f32 %v1896_v43, %v1895_v17  ;;  %v2009_v29 = vadd.f32 %v2008_v33, %v2007_v22 }
 0x1aa   :  { %v1898_v25 = vpop.f32.mrf.mxu1  ;;  %v2010_v23 = vpop.f32.mrf.mxu0 }
 0x1ab   :  { %1519 = vst [vmem:[#allocation7 + $0xc8] sm:$0xff] %v1467_v24  ;;  %v1311_v8 = vadd.f32 %v1897_v39, %v2425_v26 }
 0x1ac   :  { %v1899_v0 = vpop.f32.mrf.mxu1  ;;  %v2011_v3 = vpop.f32.mrf.mxu0 }
 0x1ad   :  { %v1472_v35 = vadd.f32 %v2009_v29, %v1311_v8  ;;  %v1900_v30 = vadd.f32 %v1899_v0, %v1898_v25  ;;  %v2012_v45 = vadd.f32 %v2011_v3, %v2010_v23 }
 0x1ae   :  { %v1901_v41 = vpop.f32.mrf.mxu1  ;;  %v2013_v44 = vpop.f32.mrf.mxu0 }
 0x1af   :  { %1520 = vst [vmem:[#allocation7 + $0xd0] sm:$0xff] %v1472_v35  ;;  %v1314_v14 = vadd.f32 %v1900_v30, %v2432_v38 }
 0x1b0   :  { %v1902_v51 = vpop.f32.mrf.mxu1  ;;  %v2014_v47 = vpop.f32.mrf.mxu0 }
 0x1b1   :  { %v1475_v28 = vadd.f32 %v2012_v45, %v1314_v14  ;;  %v1903_v46 = vadd.f32 %v1902_v51, %v1901_v41  ;;  %v2015_v6 = vadd.f32 %v2014_v47, %v2013_v44 }
 0x1b2   :  { %v1904_v36 = vpop.f32.mrf.mxu1  ;;  %v2016_v49 = vpop.f32.mrf.mxu0 }
 0x1b3   :  { %1521 = vst [vmem:[#allocation7 + $0xd8] sm:$0xff] %v1475_v28  ;;  %v1319_v26 = vadd.f32 %v1903_v46, %v2535_v31 }
 0x1b4   :  { %v1905_v9 = vpop.f32.mrf.mxu1  ;;  %v2017_v10 = vpop.f32.mrf.mxu0 }
 0x1b5   :  { %v1480_v57 = vadd.f32 %v2015_v6, %v1319_v26  ;;  %v1906_v63 = vadd.f32 %v1905_v9, %v1904_v36  ;;  %v2018_v59 = vadd.f32 %v2017_v10, %v2016_v49 }
 0x1b6   :  { %v1907_v42 = vpop.f32.mrf.mxu1  ;;  %v2019_v53 = vpop.f32.mrf.mxu0 }
 0x1b7   :  { %1522 = vst [vmem:[#allocation7 + $0xe0] sm:$0xff] %v1480_v57  ;;  %v1322_v38 = vadd.f32 %v1906_v63, %v2536_v56 }
 0x1b8   :  { %v1908_v1 = vpop.f32.mrf.mxu1  ;;  %v2020_v4 = vpop.f32.mrf.mxu0 }
 0x1b9   :  { %v1483_v16 = vadd.f32 %v2018_v59, %v1322_v38  ;;  %v1909_v52 = vadd.f32 %v1908_v1, %v1907_v42  ;;  %v2021_v5 = vadd.f32 %v2020_v4, %v2019_v53 }
 0x1ba   :  { %v1910_v48 = vpop.f32.mrf.mxu1  ;;  %v2022_v12 = vpop.f32.mrf.mxu0 }
 0x1bb   :  { %1523 = vst [vmem:[#allocation7 + $0xe8] sm:$0xff] %v1483_v16  ;;  %v1327_v55 = vadd.f32 %v1909_v52, %v2537_v15 }
 0x1bc   :  { %v1911_v11 = vpop.f32.mrf.mxu1  ;;  %v2023_v19 = vpop.f32.mrf.mxu0 }
 0x1bd   :  { %v1488_v34 = vadd.f32 %v2021_v5, %v1327_v55  ;;  %v1912_v54 = vadd.f32 %v1911_v11, %v1910_v48  ;;  %v2024_v32 = vadd.f32 %v2023_v19, %v2022_v12 }
 0x1bf   :  { %1524 = vst [vmem:[#allocation7 + $0xf0] sm:$0xff] %v1488_v34  ;;  %v1330_v50 = vadd.f32 %v1912_v54, %v2538_v37 }
 0x1c1   :  { %v1491_v7 = vadd.f32 %v2024_v32, %v1330_v50 }
 0x1c3   :  { %1525 = vst [vmem:[#allocation7 + $0xf8] sm:$0xff] %v1491_v7 }
 0x1c4   :  { %2293 = shalt.err (!%p2290_p0)
}
 0x1c5   :  { %s2315_s28 = smov 128   ;;  %s2316_s29 = smov 8  }
 0x1c6   :  { %1537 = dma.vmem_to_hbm [thread:$0]  %s1532_s26, 4096, %s2530_s3, [#allocation4], %s2315_s28, %s2315_s28, %s2316_s29  }
 0x1c7   :  { %2306 = dma.done.wait [#allocation4], 4096  }
 0x1c8   :  { %2307 = vsyncadd [#allocation4], 4294963200 }
 0x1c9   :  { %1541 = vsyncpa [#allocation3], 1 }
 0x1ca   :  { %1542 = vsyncpa [#allocation6], 1 }
 0x1cb   :  { %1543 = vsyncpa [#allocation4], 1 }

</bundles_post_ra>
